<compile_context>
chip_gen: v7x
topology: tpu7x:2x2x1
jax: 0.10.0
libtpu: 0.0.40
codegen_flags: <defaults>
</compile_context>

<pallas_src>
import jax
import jax.numpy as jnp
from jax.experimental import pallas as pl
from jax.experimental.pallas import tpu as pltpu

INPUT_DIM = 4        # iris features
HIDDEN = 50
NUM_CLASSES = 3
DROPOUT_P = 0.1

D_PAD = 8            # input features padded 4 -> 8
H_PAD = 64           # hidden padded 50 -> 64
OUT_PAD = 128        # lane-dense output slab (classes live in lanes 0..2)

# drop if r < thresh, where r ~ Uniform[0, 2^31)
_DROP_THRESHOLD = int(round(DROPOUT_P * (1 << 31)))


def _signed32(v):
    """Reinterpret a python uint32 literal as a signed int32 python int."""
    v &= 0xFFFFFFFF
    return v - (1 << 32) if v >= (1 << 31) else v


_M1 = _signed32(0x7FEB352D)
_M2 = _signed32(0x846CA68B)
_GOLDEN = _signed32(0x9E3779B9)


def _srl(v, k):
    """Logical right shift for int32 (arithmetic shift then mask off sign-extension)."""
    return jnp.bitwise_and(v >> k, (1 << (32 - k)) - 1)


def _hash_i32(v):
    """lowbias32-style integer mixer: uniform 32-bit hash of a counter (int32 in/out)."""
    v = jnp.bitwise_xor(v, _srl(v, 16))
    v = v * _M1                       # wraps mod 2^32 (two's complement)
    v = jnp.bitwise_xor(v, _srl(v, 15))
    v = v * _M2
    v = jnp.bitwise_xor(v, _srl(v, 16))
    return v


def _iris_mlp_kernel(seed_ref, x_ref, w1_ref, b1_ref, w2_ref, b2_ref,
                     w3_ref, b3_ref, o_ref):
    x = x_ref[...]                                            # (TB, D_PAD) f32

    # ---- layer1 + ReLU ---------------------------------------------------
    h1 = jnp.dot(x, w1_ref[...], preferred_element_type=jnp.float32) + b1_ref[...]
    h1 = jnp.maximum(h1, 0.0)                                 # (TB, H_PAD)

    # ---- dropout(p=0.1): counter-hash PRNG + integer threshold ------------
    tb, hp = h1.shape
    row = jax.lax.broadcasted_iota(jnp.int32, (tb, hp), 0) + pl.program_id(0) * tb
    col = jax.lax.broadcasted_iota(jnp.int32, (tb, hp), 1)
    ctr = row * hp + col + seed_ref[0] * _GOLDEN
    rnd = jnp.bitwise_and(_hash_i32(ctr), 0x7FFFFFFF)         # uniform in [0, 2^31)
    keep = rnd >= _DROP_THRESHOLD
    # NOTE: the 1/(1-p) inverted-dropout scale is pre-folded into W2.
    h1 = jnp.where(keep, h1, 0.0)

    # ---- layer2 + ReLU ---------------------------------------------------
    h2 = jnp.dot(h1, w2_ref[...], preferred_element_type=jnp.float32) + b2_ref[...]
    h2 = jnp.maximum(h2, 0.0)                                 # (TB, H_PAD)

    # ---- layer3 + softmax over classes (lane-dense padded slab) -----------
    logits = jnp.dot(h2, w3_ref[...], preferred_element_type=jnp.float32) + b3_ref[...]
    lane = jax.lax.broadcasted_iota(jnp.int32, logits.shape, 1)
    logits = jnp.where(lane < NUM_CLASSES, logits, -1e30)     # padded lanes -> exp()=0
    m = jnp.max(logits, axis=1, keepdims=True)
    e = jnp.exp(logits - m)
    denom = jnp.sum(e, axis=1, keepdims=True)
    # (pl.reciprocal(approx=True) would use the EUP on TPU, but it has no interpret
    #  lowering; a divide on a (TB, 1) column is negligible.)
    o_ref[...] = (e * (1.0 / denom)).astype(o_ref.dtype)


def _round_up(v, m):
    return (v + m - 1) // m * m


def prepare_params(params):
    """Pad params to TPU-friendly shapes and fold the 1/(1-p) dropout scale into W2.

    Input layout: weights (in, out), biases (out,). Zero padding is exact: padded
    hidden units stay 0 through ReLU and padded class logits are masked in-kernel.
    """
    w1, b1, w2, b2, w3, b3 = params
    scale = 1.0 / (1.0 - DROPOUT_P)
    w1p = jnp.zeros((D_PAD, H_PAD), jnp.float32).at[:INPUT_DIM, :HIDDEN].set(w1)
    b1p = jnp.zeros((1, H_PAD), jnp.float32).at[0, :HIDDEN].set(b1)
    w2p = jnp.zeros((H_PAD, H_PAD), jnp.float32).at[:HIDDEN, :HIDDEN].set(w2 * scale)
    b2p = jnp.zeros((1, H_PAD), jnp.float32).at[0, :HIDDEN].set(b2)
    w3p = jnp.zeros((H_PAD, OUT_PAD), jnp.float32).at[:HIDDEN, :NUM_CLASSES].set(w3)
    b3p = jnp.zeros((1, OUT_PAD), jnp.float32).at[0, :NUM_CLASSES].set(b3)
    return (w1p, b1p, w2p, b2p, w3p, b3p)


def iris_forward(x, padded_params, seed=0, block_b=1024):
    """x: (B, INPUT_DIM) float32 -> (B, 3) float32 softmax probabilities."""
    w1, b1, w2, b2, w3, b3 = padded_params
    B = x.shape[0]

    tb = min(block_b, _round_up(B, 8))          # batch tile (multiple of 8 sublanes)
    b_pad = _round_up(B, tb)
    xp = jnp.zeros((b_pad, D_PAD), jnp.float32).at[:B, :x.shape[1]].set(
        x.astype(jnp.float32))
    seed_arr = jnp.asarray([seed], dtype=jnp.int32)

    def full_spec(shape):
        return pl.BlockSpec(shape, lambda i: (0, 0))

    out = pl.pallas_call(
        _iris_mlp_kernel,
        out_shape=jax.ShapeDtypeStruct((b_pad, OUT_PAD), jnp.float32),
        grid=(b_pad // tb,),
        in_specs=[
            pl.BlockSpec(memory_space=pltpu.MemorySpace.SMEM),     # seed scalar
            pl.BlockSpec((tb, D_PAD), lambda i: (i, 0)),           # x batch tile
            full_spec((D_PAD, H_PAD)), full_spec((1, H_PAD)),      # W1, b1 (resident)
            full_spec((H_PAD, H_PAD)), full_spec((1, H_PAD)),      # W2, b2 (resident)
            full_spec((H_PAD, OUT_PAD)), full_spec((1, OUT_PAD)),  # W3, b3 (resident)
        ],
        out_specs=pl.BlockSpec((tb, OUT_PAD), lambda i: (i, 0)),
        compiler_params=pltpu.CompilerParams(
            dimension_semantics=("parallel",)),                    # v7x: 2 TCs
    )(seed_arr, xp, w1, b1, w2, b2, w3, b3)

    return out[:B, :NUM_CLASSES]


def init_params(key):
    """nn.Linear-style init; weights stored pre-transposed as (in, out), biases (out,)."""
    ks = jax.random.split(key, 6)

    def lin(kw, kb, fan_in, fan_out):
        bound = 1.0 / (fan_in ** 0.5)
        w = jax.random.uniform(kw, (fan_in, fan_out), jnp.float32, -bound, bound)
        b = jax.random.uniform(kb, (fan_out,), jnp.float32, -bound, bound)
        return w, b

    w1, b1 = lin(ks[0], ks[1], INPUT_DIM, HIDDEN)
    w2, b2 = lin(ks[2], ks[3], HIDDEN, HIDDEN)
    w3, b3 = lin(ks[4], ks[5], HIDDEN, NUM_CLASSES)
    return (w1, b1, w2, b2, w3, b3)


def reference_forward(x, params, seed=0):
    """Pure-JAX reference using the identical dropout mask (for correctness check)."""
    w1, b1, w2, b2, w3, b3 = params
    hi = jax.lax.Precision.HIGHEST
    h1 = jnp.maximum(jnp.dot(x, w1, precision=hi) + b1[None, :], 0.0)
    B = x.shape[0]
    row = jnp.arange(B, dtype=jnp.int32)[:, None]
    col = jnp.arange(HIDDEN, dtype=jnp.int32)[None, :]
    ctr = row * H_PAD + col + jnp.int32(seed) * _GOLDEN
    keep = jnp.bitwise_and(_hash_i32(ctr), 0x7FFFFFFF) >= _DROP_THRESHOLD
    h1 = jnp.where(keep, h1 / (1.0 - DROPOUT_P), 0.0)
    h2 = jnp.maximum(jnp.dot(h1, w2, precision=hi) + b2[None, :], 0.0)
    logits = jnp.dot(h2, w3, precision=hi) + b3[None, :]
    return jax.nn.softmax(logits, axis=1)


if __name__ == "__main__":
    key = jax.random.PRNGKey(0)
    pkey, xkey = jax.random.split(key)

    params = init_params(pkey)
    kernel_params = prepare_params(params)

    B = 8
    x = jax.random.normal(xkey, (B, INPUT_DIM), dtype=jnp.float32)

    out = iris_forward(x, kernel_params, seed=0)
    out = jax.block_until_ready(out)

    assert out.shape == (B, NUM_CLASSES)
    # rows of a softmax must sum to 1
    assert bool(jnp.allclose(jnp.sum(out, axis=1), 1.0, atol=1e-5))
    # match the pure-JAX reference (same dropout mask by construction)
    ref = reference_forward(x, params, seed=0)
    assert bool(jnp.allclose(out, ref, rtol=2e-3, atol=2e-3))

    print("KERNEL_OK")
</pallas_src>

<mosaic_0001>
module attributes {stable_mosaic.version = 11 : i64} {
  func.func @_iris_mlp_kernel(%arg0: i32, %arg1: memref<1xi32, #tpu.memory_space<smem>>, %arg2: memref<8x8xf32, #tpu.memory_space<vmem>>, %arg3: memref<8x64xf32, #tpu.memory_space<vmem>>, %arg4: memref<1x64xf32, #tpu.memory_space<vmem>>, %arg5: memref<64x64xf32, #tpu.memory_space<vmem>>, %arg6: memref<1x64xf32, #tpu.memory_space<vmem>>, %arg7: memref<64x128xf32, #tpu.memory_space<vmem>>, %arg8: memref<1x128xf32, #tpu.memory_space<vmem>>, %arg9: memref<8x128xf32, #tpu.memory_space<vmem>>) attributes {dimension_semantics = [#tpu.dimension_semantics<parallel>], iteration_bounds = array<i64: 1>, scalar_prefetch = 0 : i64, scratch_operands = 0 : i64, tpu.core_type = #tpu.core_type<tc>, window_params = [{transform_indices = @transform_0, window_bounds = array<i64: 1>}, {transform_indices = @transform_1, window_bounds = array<i64: 8, 8>}, {pipeline_mode = #tpu.pipeline_mode<synchronous>, transform_indices = @transform_2, window_bounds = array<i64: 8, 64>}, {pipeline_mode = #tpu.pipeline_mode<synchronous>, transform_indices = @transform_3, window_bounds = array<i64: 1, 64>}, {pipeline_mode = #tpu.pipeline_mode<synchronous>, transform_indices = @transform_4, window_bounds = array<i64: 64, 64>}, {pipeline_mode = #tpu.pipeline_mode<synchronous>, transform_indices = @transform_5, window_bounds = array<i64: 1, 64>}, {pipeline_mode = #tpu.pipeline_mode<synchronous>, transform_indices = @transform_6, window_bounds = array<i64: 64, 128>}, {pipeline_mode = #tpu.pipeline_mode<synchronous>, transform_indices = @transform_7, window_bounds = array<i64: 1, 128>}, {transform_indices = @transform_8, window_bounds = array<i64: 8, 128>}]} {
    %c0 = arith.constant 0 : index
    %c0_0 = arith.constant 0 : index
    %0 = vector.load %arg2[%c0, %c0_0] : memref<8x8xf32, #tpu.memory_space<vmem>>, vector<8x8xf32>
    %c0_1 = arith.constant 0 : index
    %c0_2 = arith.constant 0 : index
    %1 = vector.load %arg3[%c0_1, %c0_2] : memref<8x64xf32, #tpu.memory_space<vmem>>, vector<8x64xf32>
    %cst = arith.constant dense<0.000000e+00> : vector<8x64xf32>
    %2 = tpu.matmul %0, %1, %cst {dimension_numbers = #tpu.dot_dimension_numbers<[1], [0], [0], [1], [0, 0, 1, 1], [], []>} : vector<8x8xf32>, vector<8x64xf32>, vector<8x64xf32> -> vector<8x64xf32>
    %c0_3 = arith.constant 0 : index
    %c0_4 = arith.constant 0 : index
    %3 = vector.load %arg4[%c0_3, %c0_4] : memref<1x64xf32, #tpu.memory_space<vmem>>, vector<1x64xf32>
    %4 = vector.broadcast %3 : vector<1x64xf32> to vector<8x64xf32>
    %5 = arith.addf %2, %4 : vector<8x64xf32>
    %cst_5 = arith.constant 0.000000e+00 : f32
    %6 = vector.broadcast %cst_5 : f32 to vector<8x64xf32>
    %7 = arith.maximumf %5, %6 : vector<8x64xf32>
    %8 = tpu.iota {dimensions = array<i32: 0>} : vector<8x64xi32>
    %c8_i32 = arith.constant 8 : i32
    %9 = arith.muli %arg0, %c8_i32 : i32
    %10 = vector.broadcast %9 : i32 to vector<8x64xi32>
    %11 = arith.addi %8, %10 : vector<8x64xi32>
    %12 = tpu.iota {dimensions = array<i32: 1>} : vector<8x64xi32>
    %c64_i32 = arith.constant 64 : i32
    %13 = vector.broadcast %c64_i32 : i32 to vector<8x64xi32>
    %14 = arith.muli %11, %13 : vector<8x64xi32>
    %15 = arith.addi %14, %12 : vector<8x64xi32>
    %c0_6 = arith.constant 0 : index
    %16 = memref.load %arg1[%c0_6] : memref<1xi32, #tpu.memory_space<smem>>
    %c-1640531527_i32 = arith.constant -1640531527 : i32
    %17 = arith.muli %16, %c-1640531527_i32 : i32
    %18 = vector.broadcast %17 : i32 to vector<8x64xi32>
    %19 = arith.addi %15, %18 : vector<8x64xi32>
    %c16_i32 = arith.constant 16 : i32
    %20 = vector.broadcast %c16_i32 : i32 to vector<8x64xi32>
    %21 = arith.shrsi %19, %20 : vector<8x64xi32>
    %c65535_i32 = arith.constant 65535 : i32
    %22 = vector.broadcast %c65535_i32 : i32 to vector<8x64xi32>
    %23 = arith.andi %21, %22 : vector<8x64xi32>
    %24 = arith.xori %19, %23 : vector<8x64xi32>
    %c2146121005_i32 = arith.constant 2146121005 : i32
    %25 = vector.broadcast %c2146121005_i32 : i32 to vector<8x64xi32>
    %26 = arith.muli %24, %25 : vector<8x64xi32>
    %c15_i32 = arith.constant 15 : i32
    %27 = vector.broadcast %c15_i32 : i32 to vector<8x64xi32>
    %28 = arith.shrsi %26, %27 : vector<8x64xi32>
    %c131071_i32 = arith.constant 131071 : i32
    %29 = vector.broadcast %c131071_i32 : i32 to vector<8x64xi32>
    %30 = arith.andi %28, %29 : vector<8x64xi32>
    %31 = arith.xori %26, %30 : vector<8x64xi32>
    %c-2073254261_i32 = arith.constant -2073254261 : i32
    %32 = vector.broadcast %c-2073254261_i32 : i32 to vector<8x64xi32>
    %33 = arith.muli %31, %32 : vector<8x64xi32>
    %c16_i32_7 = arith.constant 16 : i32
    %34 = vector.broadcast %c16_i32_7 : i32 to vector<8x64xi32>
    %35 = arith.shrsi %33, %34 : vector<8x64xi32>
    %c65535_i32_8 = arith.constant 65535 : i32
    %36 = vector.broadcast %c65535_i32_8 : i32 to vector<8x64xi32>
    %37 = arith.andi %35, %36 : vector<8x64xi32>
    %38 = arith.xori %33, %37 : vector<8x64xi32>
    %c2147483647_i32 = arith.constant 2147483647 : i32
    %39 = vector.broadcast %c2147483647_i32 : i32 to vector<8x64xi32>
    %40 = arith.andi %38, %39 : vector<8x64xi32>
    %c214748365_i32 = arith.constant 214748365 : i32
    %41 = vector.broadcast %c214748365_i32 : i32 to vector<8x64xi32>
    %42 = arith.cmpi sge, %40, %41 : vector<8x64xi32>
    %cst_9 = arith.constant 0.000000e+00 : f32
    %43 = vector.broadcast %cst_9 : f32 to vector<8x64xf32>
    %44 = arith.select %42, %7, %43 : vector<8x64xi1>, vector<8x64xf32>
    %c0_10 = arith.constant 0 : index
    %c0_11 = arith.constant 0 : index
    %45 = vector.load %arg5[%c0_10, %c0_11] : memref<64x64xf32, #tpu.memory_space<vmem>>, vector<64x64xf32>
    %cst_12 = arith.constant dense<0.000000e+00> : vector<8x64xf32>
    %46 = tpu.matmul %44, %45, %cst_12 {dimension_numbers = #tpu.dot_dimension_numbers<[1], [0], [0], [1], [0, 0, 1, 1], [], []>} : vector<8x64xf32>, vector<64x64xf32>, vector<8x64xf32> -> vector<8x64xf32>
    %c0_13 = arith.constant 0 : index
    %c0_14 = arith.constant 0 : index
    %47 = vector.load %arg6[%c0_13, %c0_14] : memref<1x64xf32, #tpu.memory_space<vmem>>, vector<1x64xf32>
    %48 = vector.broadcast %47 : vector<1x64xf32> to vector<8x64xf32>
    %49 = arith.addf %46, %48 : vector<8x64xf32>
    %cst_15 = arith.constant 0.000000e+00 : f32
    %50 = vector.broadcast %cst_15 : f32 to vector<8x64xf32>
    %51 = arith.maximumf %49, %50 : vector<8x64xf32>
    %c0_16 = arith.constant 0 : index
    %c0_17 = arith.constant 0 : index
    %52 = vector.load %arg7[%c0_16, %c0_17] : memref<64x128xf32, #tpu.memory_space<vmem>>, vector<64x128xf32>
    %cst_18 = arith.constant dense<0.000000e+00> : vector<8x128xf32>
    %53 = tpu.matmul %51, %52, %cst_18 {dimension_numbers = #tpu.dot_dimension_numbers<[1], [0], [0], [1], [0, 0, 1, 1], [], []>} : vector<8x64xf32>, vector<64x128xf32>, vector<8x128xf32> -> vector<8x128xf32>
    %c0_19 = arith.constant 0 : index
    %c0_20 = arith.constant 0 : index
    %54 = vector.load %arg8[%c0_19, %c0_20] : memref<1x128xf32, #tpu.memory_space<vmem>>, vector<1x128xf32>
    %55 = vector.broadcast %54 : vector<1x128xf32> to vector<8x128xf32>
    %56 = arith.addf %53, %55 : vector<8x128xf32>
    %57 = tpu.iota {dimensions = array<i32: 1>} : vector<8x128xi32>
    %c3_i32 = arith.constant 3 : i32
    %58 = vector.broadcast %c3_i32 : i32 to vector<8x128xi32>
    %59 = arith.cmpi slt, %57, %58 : vector<8x128xi32>
    %cst_21 = arith.constant -1.000000e+30 : f32
    %60 = vector.broadcast %cst_21 : f32 to vector<8x128xf32>
    %61 = arith.select %59, %56, %60 : vector<8x128xi1>, vector<8x128xf32>
    %cst_22 = arith.constant dense<0xFF800000> : vector<8xf32>
    %62 = vector.multi_reduction <maximumf>, %61, %cst_22 [1] : vector<8x128xf32> to vector<8xf32>
    %63 = vector.shape_cast %62 : vector<8xf32> to vector<8x1xf32>
    %64 = vector.broadcast %63 : vector<8x1xf32> to vector<8x128xf32>
    %65 = arith.subf %61, %64 : vector<8x128xf32>
    %66 = math.exp %65 : vector<8x128xf32>
    %cst_23 = arith.constant dense<0.000000e+00> : vector<8xf32>
    %67 = vector.multi_reduction <add>, %66, %cst_23 [1] : vector<8x128xf32> to vector<8xf32>
    %68 = vector.shape_cast %67 : vector<8xf32> to vector<8x1xf32>
    %cst_24 = arith.constant 1.000000e+00 : f32
    %69 = vector.broadcast %cst_24 : f32 to vector<8x1xf32>
    %70 = arith.divf %69, %68 : vector<8x1xf32>
    %71 = vector.broadcast %70 : vector<8x1xf32> to vector<8x128xf32>
    %72 = arith.mulf %66, %71 : vector<8x128xf32>
    %c0_25 = arith.constant 0 : index
    %c0_26 = arith.constant 0 : index
    %73 = vector.load %arg9[%c0_25, %c0_26] : memref<8x128xf32, #tpu.memory_space<vmem>>, vector<8x128xf32>
    tpu.vector_store %arg9[%c0_25, %c0_26], %72 {strides = array<i32>} : memref<8x128xf32, #tpu.memory_space<vmem>>, vector<8x128xf32>,
    return
  }
  func.func @transform_0(%arg0: i32) -> i32 {
    %c0_i32 = arith.constant 0 : i32
    %c0_i32_0 = arith.constant 0 : i32
    return %c0_i32 : i32
  }
  func.func @transform_1(%arg0: i32) -> (i32, i32) {
    %c0_i32 = arith.constant 0 : i32
    %c0_i32_0 = arith.constant 0 : i32
    return %arg0, %c0_i32 : i32, i32
  }
  func.func @transform_2(%arg0: i32) -> (i32, i32) {
    %c0_i32 = arith.constant 0 : i32
    %c0_i32_0 = arith.constant 0 : i32
    %c0_i32_1 = arith.constant 0 : i32
    return %c0_i32, %c0_i32_0 : i32, i32
  }
  func.func @transform_3(%arg0: i32) -> (i32, i32) {
    %c0_i32 = arith.constant 0 : i32
    %c0_i32_0 = arith.constant 0 : i32
    %c0_i32_1 = arith.constant 0 : i32
    return %c0_i32, %c0_i32_0 : i32, i32
  }
  func.func @transform_4(%arg0: i32) -> (i32, i32) {
    %c0_i32 = arith.constant 0 : i32
    %c0_i32_0 = arith.constant 0 : i32
    %c0_i32_1 = arith.constant 0 : i32
    return %c0_i32, %c0_i32_0 : i32, i32
  }
  func.func @transform_5(%arg0: i32) -> (i32, i32) {
    %c0_i32 = arith.constant 0 : i32
    %c0_i32_0 = arith.constant 0 : i32
    %c0_i32_1 = arith.constant 0 : i32
    return %c0_i32, %c0_i32_0 : i32, i32
  }
  func.func @transform_6(%arg0: i32) -> (i32, i32) {
    %c0_i32 = arith.constant 0 : i32
    %c0_i32_0 = arith.constant 0 : i32
    %c0_i32_1 = arith.constant 0 : i32
    return %c0_i32, %c0_i32_0 : i32, i32
  }
  func.func @transform_7(%arg0: i32) -> (i32, i32) {
    %c0_i32 = arith.constant 0 : i32
    %c0_i32_0 = arith.constant 0 : i32
    %c0_i32_1 = arith.constant 0 : i32
    return %c0_i32, %c0_i32_0 : i32, i32
  }
  func.func @transform_8(%arg0: i32) -> (i32, i32) {
    %c0_i32 = arith.constant 0 : i32
    %c0_i32_0 = arith.constant 0 : i32
    return %arg0, %c0_i32 : i32, i32
  }
}

</mosaic_0001>

<bundles_post_ra>
// kernel: tpu_custom_call.1
= control target key start
LH: loop header
LB: loop body
LE: loop exit
PB: predicated region body
PF: predicated region fallthrough
CT: control target
= control target key end

     0   :  { %14 = vsyncpa [#allocation4], 0  ;;  %s759_s0 = inlined_call_operand.<no memory space> [shape: s32[1], index: 0, kind: input, shape index: {}]   ;;  %s760_s1 = inlined_call_operand.hbm [shape: f32[8,8], index: 1, kind: input, shape index: {}]   ;;  %s761_s2 = inlined_call_operand.hbm [shape: f32[8,64], index: 2, kind: input, shape index: {}]   ;;  %s762_s3 = inlined_call_operand.vmem [shape: f32[1,64], index: 3, kind: input, shape index: {}]   ;;  %s763_s4 = inlined_call_operand.hbm [shape: f32[64,64], index: 4, kind: input, shape index: {}]   ;;  %s764_s5 = inlined_call_operand.vmem [shape: f32[1,64], index: 5, kind: input, shape index: {}]   ;;  %s765_s6 = inlined_call_operand.hbm [shape: f32[64,128], index: 6, kind: input, shape index: {}]   ;;  %s766_s7 = inlined_call_operand.vmem [shape: f32[1,128], index: 7, kind: input, shape index: {}]   ;;  %s767_s8 = inlined_call_operand.hbm [shape: f32[8,128], index: 8, kind: output, shape index: {}]  }
   0x1   :  { %15 = vsyncpa [#allocation7], 0 }
   0x2   :  { %16 = vsyncpa [#allocation10], 0 }
   0x3   :  { %17 = vsyncpa [#allocation5], 0  ;;  %s629_s27 = smov [#allocation6]   ;;  %s630_s29 = smov [#allocation3]  }
   0x4   :  { %s36_s28 = sshll.u32 %s629_s27, 4  ;;  %s26_s30 = sshll.u32 %s630_s29, 4  ;;  %s37_s28 = int_to_ptr.vmem [resolvable:$true] %s36_s28  ;;  %s27_s30 = int_to_ptr.vmem [resolvable:$true] %s26_s30 }
   0x5   :  { %s511_s11 = scalar_lea.hbm %s761_s2, 128 }
   0x6   :  { %p512_p0 = scmp.ne.s32.totalorder %s761_s2, %s511_s11  ;;  %p515_p1 = scmp.lt.u32.totalorder %s511_s11, %s761_s2 }
   0x8   :  { %p517_p2 = pnand %p515_p1, %p512_p0 }
   0xa   :  { %520 = shalt.err (!%p517_p2)
}
   0xb   :  { %s521_s16 = scalar_lea.vmem %s37_s28, 128  ;;  %p526_p4 = scmp.lt.s32.totalorder %s37_s28, %s37_s28 }
   0xc   :  { %p522_p3 = scmp.ne.s32.totalorder %s37_s28, %s521_s16  ;;  %p527_p5 = scmp.lt.s32.totalorder %s521_s16, %s521_s16 }
   0xe   :  { %p528_p6 = por %p527_p5, %p526_p4 }
  0x10   :  { %p529_p7 = pnand %p528_p6, %p522_p3 }
  0x12   :  { %532 = shalt.err (!%p529_p7)
}
  0x13   :  { %39 = dma.hbm_to_vmem [thread:$0]  %s761_s2, 128, %s37_s28, [#allocation7]  }
  0x14   :  { %s533_s21 = scalar_lea.hbm %s760_s1, 128 }
  0x15   :  { %p534_p8 = scmp.ne.s32.totalorder %s760_s1, %s533_s21  ;;  %p537_p9 = scmp.lt.u32.totalorder %s533_s21, %s760_s1 }
  0x17   :  { %p539_p10 = pnand %p537_p9, %p534_p8 }
  0x19   :  { %542 = shalt.err (!%p539_p10)
}
  0x1a   :  { %s543_s26 = scalar_lea.vmem %s27_s30, 128  ;;  %p548_p12 = scmp.lt.s32.totalorder %s27_s30, %s27_s30 }
  0x1b   :  { %p544_p11 = scmp.ne.s32.totalorder %s27_s30, %s543_s26  ;;  %p549_p13 = scmp.lt.s32.totalorder %s543_s26, %s543_s26 }
  0x1d   :  { %p550_p0 = por %p549_p13, %p548_p12 }
  0x1f   :  { %p551_p1 = pnand %p550_p0, %p544_p11 }
  0x21   :  { %554 = shalt.err (!%p551_p1)
}
  0x22   :  { %29 = dma.hbm_to_vmem [thread:$0]  %s760_s1, 128, %s27_s30, [#allocation4]  }
  0x23   :  { %s631_s28 = smov [#allocation8]   ;;  %s555_s11 = scalar_lea.hbm %s763_s4, 1024 }
  0x24   :  { %s47_s29 = sshll.u32 %s631_s28, 4  ;;  %p556_p2 = scmp.ne.s32.totalorder %s763_s4, %s555_s11  ;;  %s48_s29 = int_to_ptr.vmem [resolvable:$true] %s47_s29 }
  0x25   :  { %p559_p3 = scmp.lt.u32.totalorder %s555_s11, %s763_s4 }
  0x27   :  { %p561_p4 = pnand %p559_p3, %p556_p2 }
  0x29   :  { %564 = shalt.err (!%p561_p4)
}
  0x2a   :  { %s565_s16 = scalar_lea.vmem %s48_s29, 1024  ;;  %p570_p6 = scmp.lt.s32.totalorder %s48_s29, %s48_s29 }
  0x2b   :  { %p566_p5 = scmp.ne.s32.totalorder %s48_s29, %s565_s16  ;;  %p571_p7 = scmp.lt.s32.totalorder %s565_s16, %s565_s16 }
  0x2d   :  { %p572_p8 = por %p571_p7, %p570_p6 }
  0x2f   :  { %p573_p9 = pnand %p572_p8, %p566_p5 }
  0x31   :  { %576 = shalt.err (!%p573_p9)
}
  0x32   :  { %s632_s1 = smov 128   ;;  %s633_s30 = smov 8  }
  0x33   :  { %53 = dma.hbm_to_vmem [thread:$0]  %s763_s4, 1024, %s48_s29, [#allocation7], %s632_s1, %s632_s1, %s633_s30  }
  0x34   :  { %s634_s19 = smov [#allocation9]   ;;  %s577_s23 = scalar_lea.hbm %s765_s6, 1024 }
  0x35   :  { %s61_s20 = sshll.u32 %s634_s19, 4  ;;  %p578_p10 = scmp.ne.s32.totalorder %s765_s6, %s577_s23  ;;  %s62_s20 = int_to_ptr.vmem [resolvable:$true] %s61_s20 }
  0x36   :  { %p581_p11 = scmp.lt.u32.totalorder %s577_s23, %s765_s6 }
  0x38   :  { %p583_p12 = pnand %p581_p11, %p578_p10 }
  0x3a   :  { %586 = shalt.err (!%p583_p12)
}
  0x3b   :  { %s587_s27 = scalar_lea.vmem %s62_s20, 1024  ;;  %p592_p0 = scmp.lt.s32.totalorder %s62_s20, %s62_s20 }
  0x3c   :  { %p588_p13 = scmp.ne.s32.totalorder %s62_s20, %s587_s27  ;;  %p593_p1 = scmp.lt.s32.totalorder %s587_s27, %s587_s27 }
  0x3e   :  { %p594_p2 = por %p593_p1, %p592_p0 }
  0x40   :  { %p595_p3 = pnand %p594_p2, %p588_p13 }
  0x42   :  { %598 = shalt.err (!%p595_p3)
}
  0x43   :  { %67 = dma.hbm_to_vmem [thread:$0]  %s765_s6, 1024, %s62_s20, [#allocation10], %s632_s1, %s632_s1, %s633_s30  }
  0x44   :  { %621 = dma.done.wait [#allocation4], 128  }
  0x45   :  { %622 = vsyncadd [#allocation4], 4294967168 }
  0x46   :  { %623 = dma.done.wait [#allocation7], 1152  }
  0x47   :  { %624 = vsyncadd [#allocation7], 4294966144 }
  0x48   :  { %625 = dma.done.wait [#allocation10], 1024  }
  0x49   :  { %626 = vsyncadd [#allocation10], 4294966272  ;;  %v635_v0 = vmov 0.0   ;;  %vm636_vm0 = vmmov 0   ;;  %v637_v1 = vmov 0.0|0.0   ;;  %vm91_vm1 = vcmask 64512  }
  0x4a   :  { %430 = vmatprep.subr.mxu0 %v635_v0  ;;  %432 = vmatprep.mubr.msk.f32.mxu0 %vm636_vm0, %v635_v0  ;;  %v83_v2 = vld [vmem:[#allocation6] sm:$0xff]  ;;  %v82_v3 = vld [vmem:[#allocation3] sm:$0xff]  ;;  %v193_v4 = vld [vmem:[#allocation8] sm:$0xff]  ;;  %v166_v25 = vlaneseq  ;;  %s176_s9 = smul.u32 2654435769, %s759_s0  ;;  %vm208_vm3 = vcmask 523264  }
  0x4b   :  { %473 = vmatprep.subr.bf16.mxu1 %v637_v1  ;;  %451 = vmatprep.mubr.msk.f32.mxu1 %vm636_vm0, %v635_v0  ;;  %v194_v5 = vld [vmem:[#allocation8 + $0x8] sm:$0xff]  ;;  %v195_v6 = vld [vmem:[#allocation8 + $0x10] sm:$0xff]  ;;  %v196_v7 = vld [vmem:[#allocation8 + $0x18] sm:$0xff] }
  0x4c   :  { %431 = vmatpush3.msra.mxu0 %v83_v2  ;;  %v474_v8 = vpack.c.bf16 %v194_v5, %v193_v4  ;;  %v477_v9 = vpack.c.bf16 %v196_v7, %v195_v6  ;;  %v197_v10 = vld [vmem:[#allocation8 + $0x20] sm:$0xff]  ;;  %v198_v11 = vld [vmem:[#allocation8 + $0x28] sm:$0xff]  ;;  %v199_v13 = vld [vmem:[#allocation8 + $0x30] sm:$0xff]  ;;  %v167_v26 = vshrl.u32 %v166_v25, 7  ;;  %v172_v27 = vand.u32 127, %v166_v25 }
  0x4d   :  { %433 = vmatmul.mubr.msk.f32.vlgmr.msra.gmra.mrb[0].mxu0 %vm91_vm1, %v82_v3  ;;  %485 = vmatprep.subr.bf16.mxu0 %v637_v1  ;;  %v480_v12 = vpack.c.bf16 %v198_v11, %v197_v10  ;;  %v200_v14 = vld [vmem:[#allocation8 + $0x38] sm:$0xff]  ;;  %v283_v16 = vld [vmem:[#allocation9] sm:$0xff]  ;;  %v284_v17 = vld [vmem:[#allocation9 + $0x8] sm:$0xff]  ;;  %v177_v30 = vstv %s176_s9 }
  0x4e   :  { %470 = vmatprep.mubr.msk.f32.mxu0 %vm636_vm0, %v635_v0  ;;  %475 = vmatpush3.bf16.msra.mxu1 %v474_v8  ;;  %v483_v15 = vpack.c.bf16 %v200_v14, %v199_v13  ;;  %v285_v18 = vld [vmem:[#allocation9 + $0x10] sm:$0xff]  ;;  %v486_v19 = vpack.c.bf16 %v284_v17, %v283_v16  ;;  %v286_v20 = vld [vmem:[#allocation9 + $0x18] sm:$0xff]  ;;  %v287_v22 = vld [vmem:[#allocation9 + $0x20] sm:$0xff]  ;;  %v173_v28 = vmul.u32 64, %v167_v26  ;;  %vm371_vm4 = vcmp.lt.s32.totalorder %v172_v27, 3 }
  0x4f   :  { %476 = vmatprep.subr.bf16.mxu1 %v637_v1  ;;  %v489_v21 = vpack.c.bf16 %v286_v20, %v285_v18  ;;  %v288_v23 = vld [vmem:[#allocation9 + $0x28] sm:$0xff]  ;;  %v401_v40 = vld [vmem:[%s762_s3] ss:$0 sm:$0xff]  ;;  %v290_v48 = vld [vmem:[#allocation9 + $0x38] sm:$0xff] }
  0x50   :  { %487 = vmatpush3.bf16.msra.mxu0 %v486_v19  ;;  %v492_v24 = vpack.c.bf16 %v288_v23, %v287_v22  ;;  %v174_v29 = vadd.s32 %v173_v28, %v172_v27  ;;  %v289_v47 = vld [vmem:[#allocation9 + $0x30] sm:$0xff] }
  0x51   :  { %488 = vmatprep.subr.bf16.mxu0 %v637_v1  ;;  %v495_v49 = vpack.c.bf16 %v290_v48, %v289_v47  ;;  %v406_v50 = vld [vmem:[%s764_s5] ss:$0 sm:$0xff]  ;;  %s638_s5 = smov [#allocation11]  }
  0x52   :  { %478 = vmatpush3.bf16.msra.mxu1 %v477_v9  ;;  %v178_v31 = vadd.s32 %v177_v30, %v174_v29  ;;  %v408_v55 = vld [vmem:[%s766_s7] ss:$0 sm:$0xff]  ;;  %s390_s14 = sshll.u32 %s638_s5, 4  ;;  %s391_s14 = int_to_ptr.vmem [resolvable:$true] %s390_s14 }
  0x53   :  { %479 = vmatprep.subr.bf16.mxu1 %v637_v1  ;;  %s599_s7 = scalar_lea.vmem %s391_s14, 128  ;;  %p604_p5 = scmp.lt.s32.totalorder %s391_s14, %s391_s14 }
  0x54   :  { %490 = vmatpush3.bf16.msra.mxu0 %v489_v21  ;;  %v403_v32 = vshrl.u32 %v178_v31, 16  ;;  %p600_p4 = scmp.ne.s32.totalorder %s391_s14, %s599_s7  ;;  %p605_p6 = scmp.lt.s32.totalorder %s599_s7, %s599_s7 }
  0x55   :  { %491 = vmatprep.subr.bf16.mxu0 %v637_v1 }
  0x56   :  { %481 = vmatpush3.bf16.msra.mxu1 %v480_v12  ;;  %v181_v33 = vxor.u32 %v403_v32, %v178_v31  ;;  %p606_p7 = por %p605_p6, %p604_p5 }
  0x57   :  { %482 = vmatprep.subr.bf16.mxu1 %v637_v1 }
  0x58   :  { %493 = vmatpush3.bf16.msra.mxu0 %v492_v24  ;;  %v182_v34 = vmul.u32 2146121005, %v181_v33  ;;  %p607_p8 = pnand %p606_p7, %p600_p4 }
  0x59   :  { %494 = vmatprep.subr.bf16.mxu0 %v637_v1 }
  0x5a   :  { %484 = vmatpush3.bf16.msra.mxu1 %v483_v15  ;;  %v404_v35 = vshrl.u32 %v182_v34, 15 }
  0x5c   :  { %v185_v36 = vxor.u32 %v404_v35, %v182_v34  ;;  %496 = vmatpush3.bf16.msra.mxu0 %v495_v49 }
  0x5e   :  { %v186_v37 = vmul.u32 2221713035, %v185_v36 }
  0x60   :  { %v405_v38 = vshrl.u32 %v186_v37, 16 }
  0x62   :  { %v189_v39 = vxor.u32 %v405_v38, %v186_v37 }
  0x64   :  { %v190_v41 = vand.u32 2147483647, %v189_v39 }
  0x66   :  { %vm191_vm2 = vcmp.ge.s32.totalorder %v190_v41, 214748365 }
 0x120   :  { %v161_v42 = vpop.f32.mrb[0].mxu0 }
 0x121   :  { %v162_v43 = vadd.f32 %v401_v40, %v161_v42  ;;  %v434_v44 = vpop.f32.mrb[1].mxu0 }
 0x123   :  { %v165_v45 = vmax.f32 %v162_v43, 0.0 }
 0x125   :  { %v192_v46 = vsel %vm191_vm2, %v165_v45, 0.0 }
 0x126   :  { %452 = vmatmul.mubr.msk.f32.vlgmr.msra.gmra.mrb[0].mxu1 %vm208_vm3, %v192_v46 }
 0x1f9   :  { %v278_v51 = vpop.f32.mrb[0].mxu1 }
 0x1fa   :  { %v279_v52 = vadd.f32 %v406_v50, %v278_v51  ;;  %v453_v53 = vpop.f32.mrb[1].mxu1 }
 0x1fc   :  { %v282_v54 = vmax.f32 %v279_v52, 0.0 }
 0x1fe   :  { %471 = vmatmul.mubr.msk.f32.vlgmr.msra.gmra.mrb[2].mxu0 %vm208_vm3, %v282_v54 }
 0x2d1   :  { %v367_v56 = vpop.f32.mrb[2].mxu0 }
 0x2d2   :  { %v368_v57 = vadd.f32 %v408_v55, %v367_v56  ;;  %v472_v58 = vpop.f32.mrb[3].mxu0 }
 0x2d4   :  { %v372_v59 = vsel %vm371_vm4, %v368_v57, -1e+30 }
 0x2d5   :  { %373 = vmax.xlane.f32.xlu0 %v372_v59 }
 0x362   :  { %v374_v60 = vpop.xlane.xlu0 %373 }
 0x363   :  { %v375_v61 = vsub.f32 %v372_v59, %v374_v60 }
 0x365   :  { %v376_v62 = vmul.f32 1.442695, %v375_v61 }
 0x367   :  { %507 = vpow2.f32 %v376_v62 }
 0x371   :  { %v508_v63 = vpop.eup %507 }
 0x372   :  { %378 = vadd.xlane.f32.xlu0 %v508_v63 }
 0x3ff   :  { %v379_v0 = vpop.xlane.xlu0 %378 }
 0x400   :  { %509 = vrcp.f32 %v379_v0 }
 0x40a   :  { %v510_v1 = vpop.eup %509 }
 0x40b   :  { %v382_v2 = vmul.f32 %v510_v1, %v508_v63 }
 0x40d   :  { %383 = vst [vmem:[#allocation11] sm:$0xff] %v382_v2 }
 0x40e   :  { %610 = shalt.err (!%p607_p8)
}
 0x40f   :  { %s611_s1 = scalar_lea.hbm %s767_s8, 128 }
 0x410   :  { %p612_p9 = scmp.ne.s32.totalorder %s767_s8, %s611_s1  ;;  %p615_p10 = scmp.lt.u32.totalorder %s611_s1, %s767_s8 }
 0x412   :  { %p617_p11 = pnand %p615_p10, %p612_p9 }
 0x414   :  { %620 = shalt.err (!%p617_p11)
}
 0x415   :  { %393 = dma.vmem_to_hbm [thread:$0]  %s391_s14, 128, %s767_s8, [#allocation5]  }
 0x416   :  { %627 = dma.done.wait [#allocation5], 128  }
 0x417   :  { %628 = vsyncadd [#allocation5], 4294967168 }
 0x418   :  { %397 = vsyncpa [#allocation4], 1 }
 0x419   :  { %398 = vsyncpa [#allocation7], 1 }
 0x41a   :  { %399 = vsyncpa [#allocation10], 1 }
 0x41b   :  { %400 = vsyncpa [#allocation5], 1 }

</bundles_post_ra>
